<compile_context>
chip_gen: v6e
topology: v6e:2x2x1
jax: 0.10.0
libtpu: 0.0.40
codegen_flags: <defaults>
</compile_context>

<pallas_src>
from functools import partial

import jax
import jax.numpy as jnp
from jax import lax
from jax.experimental import pallas as pl
from jax.experimental.pallas import tpu as pltpu


def _round_up(x, m):
    return ((x + m - 1) // m) * m


# ----------------------------------------------------------------------------
# Fused matmul kernel:  O = act( (P @ W) * gamma + beta [+ residual] )
# ----------------------------------------------------------------------------
def _epilogue(acc_f32, g_ref, b_ref, r_ref, o_ref, activation):
    out = acc_f32 * g_ref[...] + b_ref[...]            # f32 epilogue math
    if r_ref is not None:
        out = out + r_ref[...].astype(jnp.float32)
    if activation == "relu":
        out = jnp.maximum(out, 0.0)
    o_ref[...] = out.astype(o_ref.dtype)               # cast only at the store


def _make_kernel(activation, has_res, multi_k):
    if multi_k:
        def kernel(p_ref, w_ref, g_ref, b_ref, *rest):
            if has_res:
                r_ref, o_ref, acc_ref = rest
            else:
                r_ref = None
                o_ref, acc_ref = rest
            k = pl.program_id(1)

            @pl.when(k == 0)
            def _init():
                acc_ref[...] = jnp.zeros_like(acc_ref)

            acc_ref[...] += jnp.dot(p_ref[...], w_ref[...],
                                    preferred_element_type=jnp.float32)

            @pl.when(k == pl.num_programs(1) - 1)
            def _finalize():
                _epilogue(acc_ref[...], g_ref, b_ref, r_ref, o_ref, activation)
    else:
        # Single K tile: skip the VMEM accumulator, dot -> affine -> act -> store.
        def kernel(p_ref, w_ref, g_ref, b_ref, *rest):
            if has_res:
                r_ref, o_ref = rest
            else:
                r_ref = None
                (o_ref,) = rest
            acc = jnp.dot(p_ref[...], w_ref[...],
                          preferred_element_type=jnp.float32)
            _epilogue(acc, g_ref, b_ref, r_ref, o_ref, activation)

    return kernel


def fused_matmul(P, W, gamma, beta, residual=None, activation=None,
                 out_dtype=jnp.float32):
    """act((P @ W) * gamma + beta [+ residual]).  P:(M,K), W:(K,N), gamma/beta:(N,)."""
    M, K = P.shape
    K2, N = W.shape
    assert K == K2, (K, K2)

    # bf16 MXU inputs; accumulation stays f32 (MXUs are bf16-native on v5e/v6e/v7x).
    P = P.astype(jnp.bfloat16)
    W = W.astype(jnp.bfloat16)

    # K padding: only to a multiple of 128; TK must divide Kpad (no zero-work tiles).
    Kpad = _round_up(K, 128)
    if Kpad <= 512:
        TK = Kpad
    else:
        TK = next(c for c in (512, 384, 256, 128) if Kpad % c == 0)
    nk = Kpad // TK

    # Lane-dense output: pad N to a multiple of 128 (unmasked vst); slice off after.
    Npad = _round_up(N, 128)

    # Parallel M tile (megacore on v7x); bounds VMEM footprint to O(TM * max(TK, Npad)),
    # far below the 64 MiB v7x VMEM even with double-buffering.
    TM = min(256, _round_up(M, 16))
    Mpad = _round_up(M, TM)
    nm = Mpad // TM

    if (Mpad, Kpad) != (M, K):
        P = jnp.pad(P, ((0, Mpad - M), (0, Kpad - K)))
    if (Kpad, Npad) != (K, N):
        W = jnp.pad(W, ((0, Kpad - K), (0, Npad - N)))
    gamma = jnp.pad(jnp.asarray(gamma, jnp.float32).reshape(1, N),
                    ((0, 0), (0, Npad - N)))
    beta = jnp.pad(jnp.asarray(beta, jnp.float32).reshape(1, N),
                   ((0, 0), (0, Npad - N)))

    args = [P, W, gamma, beta]
    in_specs = [
        pl.BlockSpec((TM, TK), lambda m, k: (m, k)),
        pl.BlockSpec((TK, Npad), lambda m, k: (k, 0)),
        pl.BlockSpec((1, Npad), lambda m, k: (0, 0)),
        pl.BlockSpec((1, Npad), lambda m, k: (0, 0)),
    ]
    has_res = residual is not None
    if has_res:
        r = residual.astype(jnp.bfloat16)
        r = jnp.pad(r, ((0, Mpad - M), (0, Npad - N)))
        args.append(r)
        in_specs.append(pl.BlockSpec((TM, Npad), lambda m, k: (m, 0)))

    multi_k = nk > 1
    scratch = [pltpu.VMEM((TM, Npad), jnp.float32)] if multi_k else []

    out = pl.pallas_call(
        _make_kernel(activation, has_res, multi_k),
        out_shape=jax.ShapeDtypeStruct((Mpad, Npad), out_dtype),
        grid_spec=pltpu.PrefetchScalarGridSpec(
            num_scalar_prefetch=0,
            grid=(nm, nk),
            in_specs=in_specs,
            out_specs=pl.BlockSpec((TM, Npad), lambda m, k: (m, 0)),
            scratch_shapes=scratch,
        ),
        compiler_params=pltpu.CompilerParams(
            dimension_semantics=("parallel", "arbitrary")),
    )(*args)
    return out[:M, :N]


# ----------------------------------------------------------------------------
# Convolution wrappers (1x1 = pure matmul; 3x3 = bf16 im2col + fused matmul)
# ----------------------------------------------------------------------------
def conv1x1_fused(x, w, gamma, beta, stride=1, residual=None, activation=None,
                  out_dtype=jnp.bfloat16):
    """x: (N,H,W,Cin) NHWC, w: (1,1,Cin,Cout).  Strided 1x1 == subsample + matmul."""
    if stride > 1:
        x = x[:, ::stride, ::stride, :]
    N, H, Wd, Cin = x.shape
    Cout = w.shape[-1]
    P = x.reshape(N * H * Wd, Cin)
    Wm = w.reshape(Cin, Cout)
    res = residual.reshape(N * H * Wd, Cout) if residual is not None else None
    out = fused_matmul(P, Wm, gamma, beta, residual=res, activation=activation,
                       out_dtype=out_dtype)
    return out.reshape(N, H, Wd, Cout)


def conv3x3_fused(x, w, gamma, beta, stride=1, residual=None, activation=None,
                  out_dtype=jnp.bfloat16):
    """x: (N,H,W,Cin) NHWC, w: (3,3,Cin,Cout), padding=1."""
    N, H, Wd, Cin = x.shape
    KH, KW, _, Cout = w.shape
    pad = 1
    xp = jnp.pad(x, ((0, 0), (pad, pad), (pad, pad), (0, 0))).astype(jnp.bfloat16)
    Ho = (H + 2 * pad - KH) // stride + 1
    Wo = (Wd + 2 * pad - KW) // stride + 1
    cols = []
    for kh in range(KH):
        for kw in range(KW):
            cols.append(xp[:, kh:kh + (Ho - 1) * stride + 1:stride,
                              kw:kw + (Wo - 1) * stride + 1:stride, :])
    P = jnp.concatenate(cols, axis=-1).reshape(N * Ho * Wo, KH * KW * Cin)
    Wm = w.reshape(KH * KW * Cin, Cout)
    res = residual.reshape(N * Ho * Wo, Cout) if residual is not None else None
    out = fused_matmul(P, Wm, gamma, beta, residual=res, activation=activation,
                       out_dtype=out_dtype)
    return out.reshape(N, Ho, Wo, Cout)


# ----------------------------------------------------------------------------
# Parameters (deterministic synthetic init; shapes follow the PyTorch module)
# ----------------------------------------------------------------------------
def _init_conv(key, kh, kw, cin, cout):
    fan_in = kh * kw * cin
    return jax.random.normal(key, (kh, kw, cin, cout), jnp.float32) / jnp.sqrt(fan_in)


def _init_bn(key, c):
    k1, k2, k3, k4 = jax.random.split(key, 4)
    return dict(
        weight=1.0 + 0.1 * jax.random.normal(k1, (c,), jnp.float32),
        bias=0.1 * jax.random.normal(k2, (c,), jnp.float32),
        running_mean=0.1 * jax.random.normal(k3, (c,), jnp.float32),
        running_var=1.0 + 0.1 * jax.random.uniform(k4, (c,), jnp.float32),
    )


def _fold_bn(bn, eps=1e-5):
    # Eval-mode BatchNorm folded into a per-channel affine.
    g = bn["weight"] / jnp.sqrt(bn["running_var"] + eps)
    b = bn["bias"] - bn["running_mean"] * g
    return g, b


def init_bottleneck(key, in_planes, planes, stride=1):
    expansion = 4
    ks = jax.random.split(key, 8)
    p = dict(
        stride=stride,
        conv1=_init_conv(ks[0], 1, 1, in_planes, planes),
        bn1=_init_bn(ks[1], planes),
        conv2=_init_conv(ks[2], 3, 3, planes, planes),
        bn2=_init_bn(ks[3], planes),
        conv3=_init_conv(ks[4], 1, 1, planes, expansion * planes),
        bn3=_init_bn(ks[5], expansion * planes),
    )
    if stride != 1 or in_planes != expansion * planes:
        p["sc_conv"] = _init_conv(ks[6], 1, 1, in_planes, expansion * planes)
        p["sc_bn"] = _init_bn(ks[7], expansion * planes)
    return p


# ----------------------------------------------------------------------------
# Bottleneck forward (Pallas) and a pure-JAX reference for numerics checking
# ----------------------------------------------------------------------------
@partial(jax.jit, static_argnames=("stride",))
def _bottleneck_fwd_impl(weights, x_nchw, stride):
    """relu(bn3(conv3(relu(bn2(conv2(relu(bn1(conv1(x)))))))) + shortcut(x))."""
    x = jnp.transpose(x_nchw, (0, 2, 3, 1)).astype(jnp.float32)   # NHWC
    g1, b1 = _fold_bn(weights["bn1"])
    g2, b2 = _fold_bn(weights["bn2"])
    g3, b3 = _fold_bn(weights["bn3"])

    out = conv1x1_fused(x, weights["conv1"], g1, b1, stride=1,
                        activation="relu", out_dtype=jnp.bfloat16)
    out = conv3x3_fused(out, weights["conv2"], g2, b2, stride=stride,
                        activation="relu", out_dtype=jnp.bfloat16)
    if "sc_conv" in weights:
        gs, bs = _fold_bn(weights["sc_bn"])
        sc = conv1x1_fused(x, weights["sc_conv"], gs, bs, stride=stride,
                           activation=None, out_dtype=jnp.bfloat16)
    else:
        sc = x.astype(jnp.bfloat16)
    # conv3 + bn3 + residual add + relu fused in a single kernel call.
    out = conv1x1_fused(out, weights["conv3"], g3, b3, stride=1, residual=sc,
                        activation="relu", out_dtype=jnp.float32)
    return jnp.transpose(out, (0, 3, 1, 2))                       # back to NCHW


def bottleneck_forward(params, x_nchw):
    weights = {k: v for k, v in params.items() if k != "stride"}
    return _bottleneck_fwd_impl(weights, x_nchw, int(params["stride"]))


def _conv_ref(x, w, gamma, beta, stride, padding, residual=None, activation=None):
    xf = x.astype(jnp.bfloat16).astype(jnp.float32)
    wf = w.astype(jnp.bfloat16).astype(jnp.float32)
    y = lax.conv_general_dilated(
        xf, wf, window_strides=(stride, stride),
        padding=[(padding, padding), (padding, padding)],
        dimension_numbers=("NHWC", "HWIO", "NHWC"),
        precision=lax.Precision.HIGHEST)
    y = y * gamma.reshape(1, 1, 1, -1) + beta.reshape(1, 1, 1, -1)
    if residual is not None:
        y = y + residual.astype(jnp.float32)
    if activation == "relu":
        y = jnp.maximum(y, 0.0)
    return y


@partial(jax.jit, static_argnames=("stride",))
def _bottleneck_ref_impl(weights, x_nchw, stride):
    x = jnp.transpose(x_nchw, (0, 2, 3, 1)).astype(jnp.float32)
    g1, b1 = _fold_bn(weights["bn1"])
    g2, b2 = _fold_bn(weights["bn2"])
    g3, b3 = _fold_bn(weights["bn3"])
    out = _conv_ref(x, weights["conv1"], g1, b1, 1, 0, activation="relu")
    out = out.astype(jnp.bfloat16)
    out = _conv_ref(out, weights["conv2"], g2, b2, stride, 1, activation="relu")
    out = out.astype(jnp.bfloat16)
    if "sc_conv" in weights:
        gs, bs = _fold_bn(weights["sc_bn"])
        sc = _conv_ref(x, weights["sc_conv"], gs, bs, stride, 0)
        sc = sc.astype(jnp.bfloat16)
    else:
        sc = x.astype(jnp.bfloat16)
    out = _conv_ref(out, weights["conv3"], g3, b3, 1, 0, residual=sc,
                    activation="relu")
    return jnp.transpose(out, (0, 3, 1, 2))


def bottleneck_reference(params, x_nchw):
    weights = {k: v for k, v in params.items() if k != "stride"}
    return _bottleneck_ref_impl(weights, x_nchw, int(params["stride"]))


# ----------------------------------------------------------------------------
if __name__ == "__main__":
    root = jax.random.PRNGKey(0)
    k_mm_a, k_mm_b, k_mm_g, k_p1, k_p2, k_x1, k_x2 = jax.random.split(root, 7)

    # 1) Standalone check of the K-tiled accumulator path (Kpad=1024 -> 2 K tiles).
    A = jax.random.normal(k_mm_a, (200, 1000), jnp.float32)
    B = jax.random.normal(k_mm_b, (1000, 96), jnp.float32)
    gm = 1.0 + 0.1 * jax.random.normal(k_mm_g, (96,), jnp.float32)
    bt = 0.1 * jnp.arange(96, dtype=jnp.float32) / 96.0
    y = jax.block_until_ready(
        fused_matmul(A, B, gm, bt, activation="relu", out_dtype=jnp.float32))
    A16 = A.astype(jnp.bfloat16).astype(jnp.float32)
    B16 = B.astype(jnp.bfloat16).astype(jnp.float32)
    y_ref = jnp.maximum(
        jnp.dot(A16, B16, precision=lax.Precision.HIGHEST) * gm + bt, 0.0)
    assert y.shape == (200, 96), y.shape
    assert bool(jnp.allclose(y, y_ref, atol=1e-1, rtol=2e-2)), \
        float(jnp.max(jnp.abs(y - y_ref)))

    # 2) Bottleneck with projection shortcut (stride=2, in_planes != 4*planes).
    params_a = init_bottleneck(k_p1, in_planes=32, planes=16, stride=2)
    xa = jax.random.normal(k_x1, (2, 32, 16, 16), jnp.float32)       # NCHW
    out_a = jax.block_until_ready(bottleneck_forward(params_a, xa))
    ref_a = bottleneck_reference(params_a, xa)
    assert out_a.shape == (2, 64, 8, 8), out_a.shape
    assert bool(jnp.all(jnp.isfinite(out_a)))
    assert bool(jnp.allclose(out_a, ref_a, atol=5e-2, rtol=5e-2)), \
        float(jnp.max(jnp.abs(out_a - ref_a)))

    # 3) Bottleneck with identity shortcut (stride=1, in_planes == 4*planes).
    params_b = init_bottleneck(k_p2, in_planes=64, planes=16, stride=1)
    xb = jax.random.normal(k_x2, (2, 64, 16, 16), jnp.float32)       # NCHW
    out_b = jax.block_until_ready(bottleneck_forward(params_b, xb))
    ref_b = bottleneck_reference(params_b, xb)
    assert out_b.shape == (2, 64, 16, 16), out_b.shape
    assert bool(jnp.all(jnp.isfinite(out_b)))
    assert bool(jnp.allclose(out_b, ref_b, atol=5e-2, rtol=5e-2)), \
        float(jnp.max(jnp.abs(out_b - ref_b)))

    print("KERNEL_OK")
</pallas_src>

<mosaic_0001>
module attributes {stable_mosaic.version = 11 : i64} {
  func.func @kernel(%arg0: i32, %arg1: i32, %arg2: memref<208x512xbf16, #tpu.memory_space<vmem>>, %arg3: memref<512x128xbf16, #tpu.memory_space<vmem>>, %arg4: memref<1x128xf32, #tpu.memory_space<vmem>>, %arg5: memref<1x128xf32, #tpu.memory_space<vmem>>, %arg6: memref<208x128xf32, #tpu.memory_space<vmem>>, %arg7: memref<208x128xf32, #tpu.memory_space<vmem>>) attributes {dimension_semantics = [#tpu.dimension_semantics<parallel>, #tpu.dimension_semantics<arbitrary>], iteration_bounds = array<i64: 1, 2>, scalar_prefetch = 0 : i64, scratch_operands = 1 : i64, tpu.core_type = #tpu.core_type<tc>, window_params = [{transform_indices = @transform_0, window_bounds = array<i64: 208, 512>}, {transform_indices = @transform_1, window_bounds = array<i64: 512, 128>}, {pipeline_mode = #tpu.pipeline_mode<synchronous>, transform_indices = @transform_2, window_bounds = array<i64: 1, 128>}, {pipeline_mode = #tpu.pipeline_mode<synchronous>, transform_indices = @transform_3, window_bounds = array<i64: 1, 128>}, {transform_indices = @transform_4, window_bounds = array<i64: 208, 128>}]} {
    %c0_i32 = arith.constant 0 : i32
    %0 = arith.cmpi eq, %arg1, %c0_i32 : i32
    %1 = arith.extui %0 : i1 to i32
    %c0_i32_0 = arith.constant 0 : i32
    %2 = arith.cmpi ne, %1, %c0_i32_0 : i32
    scf.if %2 {
      %cst_9 = arith.constant 0.000000e+00 : f32
      %12 = vector.broadcast %cst_9 : f32 to vector<208x128xf32>
      %c0_10 = arith.constant 0 : index
      %c0_11 = arith.constant 0 : index
      %13 = vector.load %arg7[%c0_10, %c0_11] : memref<208x128xf32, #tpu.memory_space<vmem>>, vector<208x128xf32>
      tpu.vector_store %arg7[%c0_10, %c0_11], %12 {strides = array<i32>} : memref<208x128xf32, #tpu.memory_space<vmem>>, vector<208x128xf32>,
    } else {
    }
    %c0 = arith.constant 0 : index
    %c0_1 = arith.constant 0 : index
    %3 = vector.load %arg7[%c0, %c0_1] : memref<208x128xf32, #tpu.memory_space<vmem>>, vector<208x128xf32>
    %c0_2 = arith.constant 0 : index
    %c0_3 = arith.constant 0 : index
    %4 = vector.load %arg2[%c0_2, %c0_3] : memref<208x512xbf16, #tpu.memory_space<vmem>>, vector<208x512xbf16>
    %c0_4 = arith.constant 0 : index
    %c0_5 = arith.constant 0 : index
    %5 = vector.load %arg3[%c0_4, %c0_5] : memref<512x128xbf16, #tpu.memory_space<vmem>>, vector<512x128xbf16>
    %cst = arith.constant dense<0.000000e+00> : vector<208x128xf32>
    %6 = tpu.matmul %4, %5, %cst {dimension_numbers = #tpu.dot_dimension_numbers<[1], [0], [0], [1], [0, 0, 1, 1], [], []>} : vector<208x512xbf16>, vector<512x128xbf16>, vector<208x128xf32> -> vector<208x128xf32>
    %7 = arith.addf %3, %6 : vector<208x128xf32>
    %c0_6 = arith.constant 0 : index
    %c0_7 = arith.constant 0 : index
    %8 = vector.load %arg7[%c0_6, %c0_7] : memref<208x128xf32, #tpu.memory_space<vmem>>, vector<208x128xf32>
    tpu.vector_store %arg7[%c0_6, %c0_7], %7 {strides = array<i32>} : memref<208x128xf32, #tpu.memory_space<vmem>>, vector<208x128xf32>,
    %c1_i32 = arith.constant 1 : i32
    %9 = arith.cmpi eq, %arg1, %c1_i32 : i32
    %10 = arith.extui %9 : i1 to i32
    %c0_i32_8 = arith.constant 0 : i32
    %11 = arith.cmpi ne, %10, %c0_i32_8 : i32
    scf.if %11 {
      %c0_9 = arith.constant 0 : index
      %c0_10 = arith.constant 0 : index
      %12 = vector.load %arg7[%c0_9, %c0_10] : memref<208x128xf32, #tpu.memory_space<vmem>>, vector<208x128xf32>
      %c0_11 = arith.constant 0 : index
      %c0_12 = arith.constant 0 : index
      %13 = vector.load %arg4[%c0_11, %c0_12] : memref<1x128xf32, #tpu.memory_space<vmem>>, vector<1x128xf32>
      %14 = vector.broadcast %13 : vector<1x128xf32> to vector<208x128xf32>
      %15 = arith.mulf %12, %14 : vector<208x128xf32>
      %c0_13 = arith.constant 0 : index
      %c0_14 = arith.constant 0 : index
      %16 = vector.load %arg5[%c0_13, %c0_14] : memref<1x128xf32, #tpu.memory_space<vmem>>, vector<1x128xf32>
      %17 = vector.broadcast %16 : vector<1x128xf32> to vector<208x128xf32>
      %18 = arith.addf %15, %17 : vector<208x128xf32>
      %cst_15 = arith.constant 0.000000e+00 : f32
      %19 = vector.broadcast %cst_15 : f32 to vector<208x128xf32>
      %20 = arith.maximumf %18, %19 : vector<208x128xf32>
      %c0_16 = arith.constant 0 : index
      %c0_17 = arith.constant 0 : index
      %21 = vector.load %arg6[%c0_16, %c0_17] : memref<208x128xf32, #tpu.memory_space<vmem>>, vector<208x128xf32>
      tpu.vector_store %arg6[%c0_16, %c0_17], %20 {strides = array<i32>} : memref<208x128xf32, #tpu.memory_space<vmem>>, vector<208x128xf32>,
    } else {
    }
    return
  }
  func.func @transform_0(%arg0: i32, %arg1: i32) -> (i32, i32) {
    %c0_i32 = arith.constant 0 : i32
    return %arg0, %arg1 : i32, i32
  }
  func.func @transform_1(%arg0: i32, %arg1: i32) -> (i32, i32) {
    %c0_i32 = arith.constant 0 : i32
    %c0_i32_0 = arith.constant 0 : i32
    return %arg1, %c0_i32 : i32, i32
  }
  func.func @transform_2(%arg0: i32, %arg1: i32) -> (i32, i32) {
    %c0_i32 = arith.constant 0 : i32
    %c0_i32_0 = arith.constant 0 : i32
    %c0_i32_1 = arith.constant 0 : i32
    return %c0_i32, %c0_i32_0 : i32, i32
  }
  func.func @transform_3(%arg0: i32, %arg1: i32) -> (i32, i32) {
    %c0_i32 = arith.constant 0 : i32
    %c0_i32_0 = arith.constant 0 : i32
    %c0_i32_1 = arith.constant 0 : i32
    return %c0_i32, %c0_i32_0 : i32, i32
  }
  func.func @transform_4(%arg0: i32, %arg1: i32) -> (i32, i32) {
    %c0_i32 = arith.constant 0 : i32
    %c0_i32_0 = arith.constant 0 : i32
    return %arg0, %c0_i32 : i32, i32
  }
}

</mosaic_0001>

<bundles_post_ra>
// kernel: tpu_custom_call.1
= control target key start
LH: loop header
LB: loop body
LE: loop exit
PB: predicated region body
PF: predicated region fallthrough
CT: control target
= control target key end

     0   :  { %9 = vsyncpa [#allocation4], 0  ;;  %s2409_s0 = inlined_call_operand.hbm [shape: bf16[208,1024], index: 0, kind: input, shape index: {}]   ;;  %s2410_s1 = inlined_call_operand.hbm [shape: bf16[1024,128], index: 1, kind: input, shape index: {}]   ;;  %s2411_s2 = inlined_call_operand.vmem [shape: f32[1,128], index: 2, kind: input, shape index: {}]   ;;  %s2412_s3 = inlined_call_operand.vmem [shape: f32[1,128], index: 3, kind: input, shape index: {}]   ;;  %s2413_s4 = inlined_call_operand.hbm [shape: f32[208,128], index: 4, kind: output, shape index: {}]  }
   0x1   :  { %11 = vsyncpa [#allocation4 + $0x1], 0 }
   0x2   :  { %12 = vsyncpa [#allocation7], 0 }
   0x3   :  { %14 = vsyncpa [#allocation7 + $0x1], 0 }
   0x4   :  { %15 = vsyncpa [#allocation5], 0  ;;  %s2123_s15 = smov 0   ;;  %s2125_s16 = smov 0  }
   0x5   :  { %s2127_s17 = smov 0   ;;  %s2129_s18 = smov 0  }
   0x6   :  { %s2131_s19 = smov 0   ;;  %s2133_s20 = smov 0  }
   0x7 LB: > { %s2414_s21 = sadd.s32 4294967295, %s2085_s20   ;;  %s30_s22 = sadd.s32 1, %s2081_s19  ;;  %s2085_s20 = sphi %s2133_s20, %s21_s20   ;;  %s2081_s19 = sphi %s2131_s19, %s2424_s19   ;;  %s2077_s18 = sphi %s2129_s18, %s2423_s18   ;;  %s2073_s17 = sphi %s2127_s17, %s2422_s17   ;;  %s2069_s16 = sphi %s2125_s16, %s2421_s16   ;;  %s2065_s15 = sphi %s2123_s15, %s2420_s15  }
   0x8   : > { %p31_p0 = scmp.ge.s32.totalorder %s30_s22, 2  ;;  %s42_s23 = sadd.s32 1, %s2073_s17 }
   0x9   : > { %p49_p1 = scmp.ne.s32.totalorder %s2073_s17, %s2069_s16  ;;  %p50_p2 = scmp.eq.s32.totalorder %s2085_s20, 0 }
   0xa   : > { %s2426_s22 = smov (%p31_p0, %s30_s22), 0  ;;  %p55_p4 = scmp.ne.s32.totalorder %s2069_s16, %s2065_s15 }
   0xb   : > { %p51_p3 = por %p50_p2, %p49_p1  ;;  %s38_s24 = ssub.s32 %s2081_s19, %s2426_s22 }
   0xc   : > { %p56_p5 = scmp.eq.s32.totalorder %s2414_s21, 0  ;;  %p40_p6 = scmp.eq.s32.totalorder %s38_s24, 0 }
   0xd   : > { %p1777_p8 = scmp.lt.s32.totalorder %s2085_s20, 2  ;;  %s2173_s27 = sand.u32 1, %s2073_s17  }
   0xe   : > { %p2164_p7 = por %p56_p5, %p55_p4  ;;  %s1570_s28 = sshll.u32 %s2081_s19, 8 }
   0xf   : > { %s2170_s26 = scalar_select %p40_p6, %s2073_s17, %s42_s23  }
  0x10   : > { %s1760_s29 = smul.u32 416, %s2173_s27  ;;  %s192_s6 = scalar_lea.hbm %s2409_s0, %s1570_s28 }
  0x11   : > { %p2180_p9 = pnand %p1777_p8, %p51_p3  ;;  %p1476_p10 = scmp.ge.s32.totalorder %s2085_s20, 1 }
  0x12   : > { %s183_s8 = scalar_lea.vmem [#allocation3], %s1760_s29  ;;  %s180_s10 = scalar_lea.sflag [#allocation4], %s2173_s27 }
  0x13   : > { %s193_s9 = sshll.u32 %s183_s8, 4  ;;  %p1949_p11 = pneg %p2180_p9  ;;  %s194_s9 = int_to_ptr.vmem [resolvable:$true] %s193_s9 }
  0x14   : > { %s1960_s11 = scalar_lea.vmem %s194_s9, 6656  ;;  %s2087_s12 = smov [#allocation3]  }
  0x15   : > { %p1961_p12 = scmp.ne.s32.totalorder %s194_s9, %s1960_s11  ;;  %s1965_s13 = sshll.u32 %s2087_s12, 4  ;;  %s1966_s13 = int_to_ptr.vmem [resolvable:$false] %s1965_s13 }
  0x16   : > { %s1967_s14 = scalar_lea.vmem %s1966_s13, 13312  ;;  %p1968_p1 = scmp.lt.s32.totalorder %s194_s9, %s1966_s13 }
  0x17   : > { %p1963_p13 = pnand %p1961_p12, %p1949_p11  ;;  %p1969_p2 = scmp.lt.s32.totalorder %s1967_s14, %s1960_s11 }
  0x19   : > { %p1964_p0 = pneg %p1963_p13  ;;  %p1970_p3 = por %p1969_p2, %p1968_p1 }
  0x1b   : > { %p1971_p4 = pnand %p1970_p3, %p1964_p0 }
  0x1d   : > { %1974 = shalt.err (!%p1971_p4)
}
  0x1e   : > { %s2088_s15 = smov 512   ;;  %s2089_s23 = smov 256  }
  0x1f   : > { %s2090_s24 = smov 16   ;;  %p222_p5 = scmp.lt.s32.totalorder %s2085_s20, 3 }
  0x20   : > { %1773 = dma.hbm_to_vmem [thread:$0]  (!%p2180_p9), %s192_s6, 6656, %s194_s9, %s180_s10, %s2088_s15, %s2089_s23, %s2090_s24  }
  0x21   : > { %s1473_s28 = sshll.u32 %s2173_s27, 8  ;;  %s1571_s29 = sshll.u32 %s2081_s19, 12 }
  0x22   : > { %p2198_p6 = pnand %p1476_p10, %p222_p5  ;;  %s213_s11 = scalar_lea.hbm %s2410_s1, %s1571_s29 }
  0x23   : > { %s207_s12 = scalar_lea.vmem [#allocation6], %s1473_s28  ;;  %s204_s14 = scalar_lea.sflag [#allocation7], %s2173_s27 }
  0x24   : > { %s214_s13 = sshll.u32 %s207_s12, 4  ;;  %s2091_s6 = smov [#allocation6]   ;;  %s215_s13 = int_to_ptr.vmem [resolvable:$true] %s214_s13 }
  0x25   : > { %s1988_s21 = scalar_lea.vmem %s215_s13, 4096  ;;  %s1993_s9 = sshll.u32 %s2091_s6, 4  ;;  %s1994_s9 = int_to_ptr.vmem [resolvable:$false] %s1993_s9 }
  0x26   : > { %p1989_p8 = scmp.ne.s32.totalorder %s215_s13, %s1988_s21  ;;  %s1995_s10 = scalar_lea.vmem %s1994_s9, 8192 }
  0x27   : > { %p1996_p10 = scmp.lt.s32.totalorder %s215_s13, %s1994_s9  ;;  %p1997_p0 = scmp.lt.s32.totalorder %s1995_s10, %s1988_s21 }
  0x28   : > { %p1991_p12 = pnand %p1989_p8, %p1949_p11 }
  0x29   : > { %p1998_p1 = por %p1997_p0, %p1996_p10 }
  0x2a   : > { %p1992_p13 = pneg %p1991_p12 }
  0x2c   : > { %p1999_p2 = pnand %p1998_p1, %p1992_p13 }
  0x2e   : > { %2002 = shalt.err (!%p1999_p2)
}
  0x2f   : > { %s2092_s15 = smov 64   ;;  %s2093_s23 = smov 4  }
  0x30   : > { %1776 = dma.hbm_to_vmem [thread:$0]  (!%p2180_p9), %s213_s11, 4096, %s215_s13, %s204_s14, %s2092_s15, %s2092_s15, %s2093_s23  }
  0x31   : > { %226 = sbr.rel (%p2198_p6) target bundleno = 459 (0x1cb), region = 36  ;;  %s228_s27 = sand.u32 (!%p2198_p6), 1, %s2069_s16  }
  0x32   : > { %s1761_s24 = smul.u32 (!%p2198_p6), 416, %s228_s27  ;;  %s229_s28 = scalar_lea.sflag (!%p2198_p6), [#allocation4], %s228_s27 }
  0x34   : > { %s2214_s29 = scalar_lea.vmem (!%p2198_p6), [#allocation3], %s1761_s24 }
  0x36   : > { %2052 = dma.done.wait (%p2164_p7), %s229_s28, 6656  }
  0x37   : > { %2054 = vsyncadd (%p2164_p7), %s229_s28, 4294960640  ;;  %s1477_s21 = sshll.u32 %s228_s27, 8  ;;  %s238_s5 = scalar_lea.sflag [#allocation7], %s228_s27 }
  0x38   : > { %s2220_s7 = scalar_lea.vmem [#allocation6], %s1477_s21 }
  0x39   : > { %2056 = dma.done.wait (%p2164_p7), %s238_s5, 4096  }
  0x3a   : > { %2058 = vsyncadd (%p2164_p7), %s238_s5, 4294963200  ;;  %p1478_p9 = scmp.ne.s32.totalorder %s2077_s18, 0 }
  0x3c   : > { %274 = sbr.rel (%p1478_p9) target bundleno = 79 (0x4f), region = 48 }
  0x41   : > { %v2094_v0 = vmov 0.0  }
  0x42   : > { %275 = vst [vmem:[#allocation2 + $0xb0] sm:$0xff] %v2094_v0  ;;  %276 = vst [vmem:[#allocation2] sm:$0xff] %v2094_v0 }
  0x43   : > { %277 = vst [vmem:[#allocation2 + $0x10] sm:$0xff] %v2094_v0  ;;  %278 = vst [vmem:[#allocation2 + $0x48] sm:$0xff] %v2094_v0 }
  0x44   : > { %279 = vst [vmem:[#allocation2 + $0x60] sm:$0xff] %v2094_v0  ;;  %280 = vst [vmem:[#allocation2 + $0x28] sm:$0xff] %v2094_v0 }
  0x45   : > { %281 = vst [vmem:[#allocation2 + $0x40] sm:$0xff] %v2094_v0  ;;  %282 = vst [vmem:[#allocation2 + $0x78] sm:$0xff] %v2094_v0 }
  0x46   : > { %283 = vst [vmem:[#allocation2 + $0x80] sm:$0xff] %v2094_v0  ;;  %284 = vst [vmem:[#allocation2 + $0xa8] sm:$0xff] %v2094_v0 }
  0x47   : > { %285 = vst [vmem:[#allocation2 + $0x50] sm:$0xff] %v2094_v0  ;;  %286 = vst [vmem:[#allocation2 + $0x30] sm:$0xff] %v2094_v0 }
  0x48   : > { %287 = vst [vmem:[#allocation2 + $0x88] sm:$0xff] %v2094_v0  ;;  %288 = vst [vmem:[#allocation2 + $0x70] sm:$0xff] %v2094_v0 }
  0x49   : > { %289 = vst [vmem:[#allocation2 + $0x8] sm:$0xff] %v2094_v0  ;;  %290 = vst [vmem:[#allocation2 + $0x38] sm:$0xff] %v2094_v0 }
  0x4a   : > { %291 = vst [vmem:[#allocation2 + $0x20] sm:$0xff] %v2094_v0  ;;  %292 = vst [vmem:[#allocation2 + $0xb8] sm:$0xff] %v2094_v0 }
  0x4b   : > { %293 = vst [vmem:[#allocation2 + $0x58] sm:$0xff] %v2094_v0  ;;  %294 = vst [vmem:[#allocation2 + $0xc8] sm:$0xff] %v2094_v0 }
  0x4c   : > { %295 = vst [vmem:[#allocation2 + $0xa0] sm:$0xff] %v2094_v0  ;;  %296 = vst [vmem:[#allocation2 + $0x90] sm:$0xff] %v2094_v0 }
  0x4d   : > { %297 = vst [vmem:[#allocation2 + $0x98] sm:$0xff] %v2094_v0  ;;  %298 = vst [vmem:[#allocation2 + $0x18] sm:$0xff] %v2094_v0 }
  0x4e   : > { %299 = vst [vmem:[#allocation2 + $0xc0] sm:$0xff] %v2094_v0  ;;  %300 = vst [vmem:[#allocation2 + $0x68] sm:$0xff] %v2094_v0 }
  0x4f PF: > { %v1837_v1 = vld [vmem:[%s2220_s7 + $0x78] sm:$0xff]   ;;  %v1841_v5 = vld [vmem:[%s2220_s7 + $0x70] sm:$0xff]   ;;  %v1845_v9 = vld [vmem:[%s2220_s7 + $0x68] sm:$0xff]   ;;  %p1563_p7 = scmp.ne.s32.totalorder %s2077_s18, 1 }
  0x50   : > { %v1838_v2 = vld [vmem:[%s2220_s7 + $0xf8] sm:$0xff]   ;;  %1572 = vmatprep.subr.bf16.mxu0 %v1837_v1  ;;  %v1842_v6 = vld [vmem:[%s2220_s7 + $0xf0] sm:$0xff]   ;;  %v1846_v10 = vld [vmem:[%s2220_s7 + $0xe8] sm:$0xff]  }
  0x51   : > { %v1839_v3 = vld [vmem:[%s2220_s7 + $0x38] sm:$0xff]   ;;  %1666 = vmatprep.subr.bf16.mxu1 %v1838_v2  ;;  %v1843_v7 = vld [vmem:[%s2220_s7 + $0x30] sm:$0xff]   ;;  %v1847_v11 = vld [vmem:[%s2220_s7 + $0x28] sm:$0xff]  }
  0x52   : > { %v1840_v4 = vld [vmem:[%s2220_s7 + $0xb8] sm:$0xff]   ;;  %1573 = vmatpush3.bf16.msra.mxu0 %v1839_v3  ;;  %v1844_v8 = vld [vmem:[%s2220_s7 + $0xb0] sm:$0xff]   ;;  %v1848_v12 = vld [vmem:[%s2220_s7 + $0xa8] sm:$0xff]  }
  0x53   : > { %1667 = vmatpush3.bf16.msra.mxu1 %v1840_v4  ;;  %1574 = vmatprep.subr.bf16.mxu0 %v1841_v5  ;;  %v1849_v13 = vld [vmem:[%s2220_s7 + $0x60] sm:$0xff]   ;;  %v1853_v17 = vld [vmem:[%s2220_s7 + $0x58] sm:$0xff]   ;;  %v1857_v21 = vld [vmem:[%s2220_s7 + $0x50] sm:$0xff]  }
  0x54   : > { %1668 = vmatprep.subr.bf16.mxu1 %v1842_v6  ;;  %v1850_v14 = vld [vmem:[%s2220_s7 + $0xe0] sm:$0xff]   ;;  %v1854_v18 = vld [vmem:[%s2220_s7 + $0xd8] sm:$0xff]   ;;  %v1858_v22 = vld [vmem:[%s2220_s7 + $0xd0] sm:$0xff]  }
  0x55   : > { %v1851_v15 = vld [vmem:[%s2220_s7 + $0x20] sm:$0xff]   ;;  %v1855_v19 = vld [vmem:[%s2220_s7 + $0x18] sm:$0xff]   ;;  %v1859_v23 = vld [vmem:[%s2220_s7 + $0x10] sm:$0xff]  }
  0x56   : > { %1575 = vmatpush3.bf16.msra.mxu0 %v1843_v7  ;;  %v1852_v16 = vld [vmem:[%s2220_s7 + $0xa0] sm:$0xff]   ;;  %v1856_v20 = vld [vmem:[%s2220_s7 + $0x98] sm:$0xff]   ;;  %v1860_v24 = vld [vmem:[%s2220_s7 + $0x90] sm:$0xff]  }
  0x57   : > { %1669 = vmatpush3.bf16.msra.mxu1 %v1844_v8  ;;  %1576 = vmatprep.subr.bf16.mxu0 %v1845_v9  ;;  %v1861_v25 = vld [vmem:[%s2220_s7 + $0x48] sm:$0xff]   ;;  %v1865_v29 = vld [vmem:[%s2220_s7 + $0x40] sm:$0xff]  }
  0x58   : > { %1670 = vmatprep.subr.bf16.mxu1 %v1846_v10  ;;  %v1862_v26 = vld [vmem:[%s2220_s7 + $0xc8] sm:$0xff]   ;;  %v1866_v30 = vld [vmem:[%s2220_s7 + $0xc0] sm:$0xff]  }
  0x59   : > { %v1863_v27 = vld [vmem:[%s2220_s7 + $0x8] sm:$0xff]   ;;  %v1867_v31 = vld [vmem:[%s2220_s7] sm:$0xff]  }
  0x5a   : > { %1577 = vmatpush3.bf16.msra.mxu0 %v1847_v11  ;;  %v1864_v28 = vld [vmem:[%s2220_s7 + $0x88] sm:$0xff]   ;;  %v1868_v32 = vld [vmem:[%s2220_s7 + $0x80] sm:$0xff]  }
  0x5b   : > { %1671 = vmatpush3.bf16.msra.mxu1 %v1848_v12  ;;  %1578 = vmatprep.subr.bf16.mxu0 %v1849_v13  ;;  %v1869_v33 = vld [vmem:[%s2214_s29] ss:$16 sps:$4 sm:$0xff]   ;;  %v1871_v34 = vld [vmem:[%s2214_s29 + $0x4] ss:$16 sps:$4 sm:$0xff]   ;;  %v1872_v35 = vld [vmem:[%s2214_s29 + $0x8] ss:$16 sps:$4 sm:$0xff]  }
  0x5c   : > { %1672 = vmatprep.subr.bf16.mxu1 %v1850_v14  ;;  %v1874_v36 = vld [vmem:[%s2214_s29 + $0xc] ss:$16 sps:$4 sm:$0xff]   ;;  %927 = vmatprep.mubr.bf16.mxu0 %v1871_v34  ;;  %v1875_v37 = vld [vmem:[%s2214_s29 + $0x24] ss:$16 sps:$4 sm:$0xff]   ;;  %v1879_v39 = vld [vmem:[%s2214_s29 + $0x20] ss:$16 sps:$4 sm:$0xff]  }
  0x5d   : > { %1064 = vmatprep.mubr.bf16.mxu1 %v1874_v36  ;;  %v1877_v38 = vld [vmem:[%s2214_s29 + $0x2c] ss:$16 sps:$4 sm:$0xff]   ;;  %v1880_v40 = vld [vmem:[%s2214_s29 + $0x28] ss:$16 sps:$4 sm:$0xff]   ;;  %v1881_v41 = vld [vmem:[%s2214_s29 + $0x44] ss:$16 sps:$4 sm:$0xff]  }
  0x5e   : > { %1579 = vmatpush3.bf16.msra.mxu0 %v1851_v15  ;;  %v1883_v42 = vld [vmem:[%s2214_s29 + $0x4c] ss:$16 sps:$4 sm:$0xff]   ;;  %v1885_v43 = vld [vmem:[%s2214_s29 + $0x40] ss:$16 sps:$4 sm:$0xff]   ;;  %v1886_v44 = vld [vmem:[%s2214_s29 + $0x48] ss:$16 sps:$4 sm:$0xff]  }
  0x5f   : > { %1673 = vmatpush3.bf16.msra.mxu1 %v1852_v16  ;;  %1580 = vmatprep.subr.bf16.mxu0 %v1853_v17  ;;  %v1887_v45 = vld [vmem:[%s2214_s29 + $0x64] ss:$16 sps:$4 sm:$0xff]   ;;  %v1889_v46 = vld [vmem:[%s2214_s29 + $0x6c] ss:$16 sps:$4 sm:$0xff]   ;;  %v1891_v47 = vld [vmem:[%s2214_s29 + $0x60] ss:$16 sps:$4 sm:$0xff]  }
  0x60   : > { %1674 = vmatprep.subr.bf16.mxu1 %v1854_v18  ;;  %v1892_v48 = vld [vmem:[%s2214_s29 + $0x68] ss:$16 sps:$4 sm:$0xff]   ;;  %v1893_v49 = vld [vmem:[%s2214_s29 + $0x84] ss:$16 sps:$4 sm:$0xff]   ;;  %v1895_v50 = vld [vmem:[%s2214_s29 + $0x8c] ss:$16 sps:$4 sm:$0xff]  }
  0x61   : > { %v1897_v51 = vld [vmem:[%s2214_s29 + $0x80] ss:$16 sps:$4 sm:$0xff]   ;;  %v1898_v52 = vld [vmem:[%s2214_s29 + $0x88] ss:$16 sps:$4 sm:$0xff]   ;;  %v1899_v53 = vld [vmem:[%s2214_s29 + $0xa4] ss:$16 sps:$4 sm:$0xff]  }
  0x62   : > { %1581 = vmatpush3.bf16.msra.mxu0 %v1855_v19  ;;  %v1901_v54 = vld [vmem:[%s2214_s29 + $0xac] ss:$16 sps:$4 sm:$0xff]   ;;  %v1903_v55 = vld [vmem:[%s2214_s29 + $0xa0] ss:$16 sps:$4 sm:$0xff]   ;;  %v1904_v56 = vld [vmem:[%s2214_s29 + $0xa8] ss:$16 sps:$4 sm:$0xff]  }
  0x63   : > { %1675 = vmatpush3.bf16.msra.mxu1 %v1856_v20  ;;  %1582 = vmatprep.subr.bf16.mxu0 %v1857_v21  ;;  %v1905_v57 = vld [vmem:[%s2214_s29 + $0xc4] ss:$16 sps:$4 sm:$0xff]   ;;  %v1907_v58 = vld [vmem:[%s2214_s29 + $0xcc] ss:$16 sps:$4 sm:$0xff]   ;;  %v1909_v59 = vld [vmem:[%s2214_s29 + $0xc0] ss:$16 sps:$4 sm:$0xff]  }
  0x64   : > { %1676 = vmatprep.subr.bf16.mxu1 %v1858_v22  ;;  %v1910_v60 = vld [vmem:[%s2214_s29 + $0xc8] ss:$16 sps:$4 sm:$0xff]   ;;  %v1911_v61 = vld [vmem:[%s2214_s29 + $0xe4] ss:$16 sps:$4 sm:$0xff]   ;;  %v1913_v62 = vld [vmem:[%s2214_s29 + $0xec] ss:$16 sps:$4 sm:$0xff]  }
  0x65   : > { %v1915_v63 = vld [vmem:[%s2214_s29 + $0xe0] ss:$16 sps:$4 sm:$0xff]   ;;  %v1916_v0 = vld [vmem:[%s2214_s29 + $0xe8] ss:$16 sps:$4 sm:$0xff]   ;;  %v1917_v1 = vld [vmem:[%s2214_s29 + $0x104] ss:$16 sps:$4 sm:$0xff]  }
  0x66   : > { %1583 = vmatpush3.bf16.msra.mxu0 %v1859_v23  ;;  %v1919_v2 = vld [vmem:[%s2214_s29 + $0x10c] ss:$16 sps:$4 sm:$0xff]   ;;  %v1921_v3 = vld [vmem:[%s2214_s29 + $0x100] ss:$16 sps:$4 sm:$0xff]   ;;  %v1922_v4 = vld [vmem:[%s2214_s29 + $0x108] ss:$16 sps:$4 sm:$0xff]  }
  0x67   : > { %1677 = vmatpush3.bf16.msra.mxu1 %v1860_v24  ;;  %1584 = vmatprep.subr.bf16.mxu0 %v1861_v25  ;;  %v1923_v5 = vld [vmem:[%s2214_s29 + $0x124] ss:$16 sps:$4 sm:$0xff]   ;;  %v1925_v6 = vld [vmem:[%s2214_s29 + $0x12c] ss:$16 sps:$4 sm:$0xff]   ;;  %v1927_v7 = vld [vmem:[%s2214_s29 + $0x120] ss:$16 sps:$4 sm:$0xff]  }
  0x68   : > { %1678 = vmatprep.subr.bf16.mxu1 %v1862_v26  ;;  %v1928_v8 = vld [vmem:[%s2214_s29 + $0x128] ss:$16 sps:$4 sm:$0xff]   ;;  %v1929_v9 = vld [vmem:[%s2214_s29 + $0x144] ss:$16 sps:$4 sm:$0xff]   ;;  %v1931_v10 = vld [vmem:[%s2214_s29 + $0x14c] ss:$16 sps:$4 sm:$0xff]  }
  0x69   : > { %v1933_v11 = vld [vmem:[%s2214_s29 + $0x140] ss:$16 sps:$4 sm:$0xff]   ;;  %v1934_v12 = vld [vmem:[%s2214_s29 + $0x148] ss:$16 sps:$4 sm:$0xff]   ;;  %v1935_v13 = vld [vmem:[%s2214_s29 + $0x164] ss:$16 sps:$4 sm:$0xff]  }
  0x6a   : > { %1585 = vmatpush3.bf16.msra.mxu0 %v1863_v27  ;;  %v1937_v14 = vld [vmem:[%s2214_s29 + $0x16c] ss:$16 sps:$4 sm:$0xff]   ;;  %v1939_v15 = vld [vmem:[%s2214_s29 + $0x160] ss:$16 sps:$4 sm:$0xff]   ;;  %v1940_v16 = vld [vmem:[%s2214_s29 + $0x168] ss:$16 sps:$4 sm:$0xff]  }
  0x6b   : > { %1679 = vmatpush3.bf16.msra.mxu1 %v1864_v28  ;;  %1586 = vmatprep.subr.bf16.mxu0 %v1865_v29  ;;  %v1941_v17 = vld [vmem:[%s2214_s29 + $0x184] ss:$16 sps:$4 sm:$0xff]   ;;  %v1943_v18 = vld [vmem:[%s2214_s29 + $0x18c] ss:$16 sps:$4 sm:$0xff]   ;;  %v1945_v19 = vld [vmem:[%s2214_s29 + $0x180] ss:$16 sps:$4 sm:$0xff]  }
  0x6c   : > { %1680 = vmatprep.subr.bf16.mxu1 %v1866_v30  ;;  %v1946_v20 = vld [vmem:[%s2214_s29 + $0x188] ss:$16 sps:$4 sm:$0xff]   ;;  %v301_v28 = vld [vmem:[#allocation2 + $0xb0] sm:$0xff] }
  0x6e   : > { %1587 = vmatpush3.bf16.msra.mxu0 %v1867_v31 }
  0x6f   : > { %1681 = vmatpush3.bf16.msra.mxu1 %v1868_v32 }
  0x71   : > { %928 = vmatmul.mubr.bf16.vlgmr.msra.gmra.mxu0 %v1869_v33 }
  0x72   : > { %1065 = vmatmul.mubr.bf16.vlgmr.msra.gmra.mxu1 %v1872_v35  ;;  %935 = vmatprep.mubr.bf16.mxu0 %v1875_v37  ;;  %v302_v37 = vld [vmem:[#allocation2] sm:$0xff] }
  0x73   : > { %1072 = vmatprep.mubr.bf16.mxu1 %v1877_v38 }
  0x79   : > { %936 = vmatmul.mubr.bf16.gmra.mxu0 %v1879_v39 }
  0x7a   : > { %1073 = vmatmul.mubr.bf16.gmra.mxu1 %v1880_v40  ;;  %943 = vmatprep.mubr.bf16.mxu0 %v1881_v41 }
  0x7b   : > { %1080 = vmatprep.mubr.bf16.mxu1 %v1883_v42 }
  0x81   : > { %944 = vmatmul.mubr.bf16.gmra.mxu0 %v1885_v43 }
  0x82   : > { %1081 = vmatmul.mubr.bf16.gmra.mxu1 %v1886_v44  ;;  %951 = vmatprep.mubr.bf16.mxu0 %v1887_v45 }
  0x83   : > { %1088 = vmatprep.mubr.bf16.mxu1 %v1889_v46  ;;  %v303_v46 = vld [vmem:[#allocation2 + $0x10] sm:$0xff] }
  0x89   : > { %952 = vmatmul.mubr.bf16.gmra.mxu0 %v1891_v47 }
  0x8a   : > { %1089 = vmatmul.mubr.bf16.gmra.mxu1 %v1892_v48  ;;  %959 = vmatprep.mubr.bf16.mxu0 %v1893_v49 }
  0x8b   : > { %1096 = vmatprep.mubr.bf16.mxu1 %v1895_v50 }
  0x91   : > { %960 = vmatmul.mubr.bf16.gmra.mxu0 %v1897_v51 }
  0x92   : > { %1097 = vmatmul.mubr.bf16.gmra.mxu1 %v1898_v52  ;;  %967 = vmatprep.mubr.bf16.mxu0 %v1899_v53 }
  0x93   : > { %1104 = vmatprep.mubr.bf16.mxu1 %v1901_v54 }
  0x99   : > { %968 = vmatmul.mubr.bf16.gmra.mxu0 %v1903_v55  ;;  %v304_v55 = vld [vmem:[#allocation2 + $0x48] sm:$0xff] }
  0x9a   : > { %1105 = vmatmul.mubr.bf16.gmra.mxu1 %v1904_v56  ;;  %975 = vmatprep.mubr.bf16.mxu0 %v1905_v57 }
  0x9b   : > { %1112 = vmatprep.mubr.bf16.mxu1 %v1907_v58 }
  0xa1   : > { %976 = vmatmul.mubr.bf16.gmra.mxu0 %v1909_v59 }
  0xa2   : > { %1113 = vmatmul.mubr.bf16.gmra.mxu1 %v1910_v60  ;;  %983 = vmatprep.mubr.bf16.mxu0 %v1911_v61 }
  0xa3   : > { %1120 = vmatprep.mubr.bf16.mxu1 %v1913_v62 }
  0xa9   : > { %984 = vmatmul.mubr.bf16.gmra.mxu0 %v1915_v63 }
  0xaa   : > { %1121 = vmatmul.mubr.bf16.gmra.mxu1 %v1916_v0  ;;  %991 = vmatprep.mubr.bf16.mxu0 %v1917_v1  ;;  %v305_v0 = vld [vmem:[#allocation2 + $0x60] sm:$0xff] }
  0xab   : > { %1128 = vmatprep.mubr.bf16.mxu1 %v1919_v2 }
  0xb1   : > { %992 = vmatmul.mubr.bf16.gmra.mxu0 %v1921_v3 }
  0xb2   : > { %1129 = vmatmul.mubr.bf16.gmra.mxu1 %v1922_v4  ;;  %999 = vmatprep.mubr.bf16.mxu0 %v1923_v5 }
  0xb3   : > { %1136 = vmatprep.mubr.bf16.mxu1 %v1925_v6 }
  0xb9   : > { %1000 = vmatmul.mubr.bf16.gmra.mxu0 %v1927_v7 }
  0xba   : > { %1137 = vmatmul.mubr.bf16.gmra.mxu1 %v1928_v8  ;;  %1007 = vmatprep.mubr.bf16.mxu0 %v1929_v9  ;;  %v306_v9 = vld [vmem:[#allocation2 + $0x28] sm:$0xff] }
  0xbb   : > { %1144 = vmatprep.mubr.bf16.mxu1 %v1931_v10 }
  0xc1   : > { %1008 = vmatmul.mubr.bf16.gmra.mxu0 %v1933_v11 }
  0xc2   : > { %1145 = vmatmul.mubr.bf16.gmra.mxu1 %v1934_v12  ;;  %1015 = vmatprep.mubr.bf16.mxu0 %v1935_v13 }
  0xc3   : > { %1152 = vmatprep.mubr.bf16.mxu1 %v1937_v14 }
  0xc9   : > { %1016 = vmatmul.mubr.bf16.gmra.mxu0 %v1939_v15 }
  0xca   : > { %1153 = vmatmul.mubr.bf16.gmra.mxu1 %v1940_v16  ;;  %1023 = vmatprep.mubr.bf16.mxu0 %v1941_v17 }
  0xcb   : > { %1160 = vmatprep.mubr.bf16.mxu1 %v1943_v18  ;;  %v307_v18 = vld [vmem:[#allocation2 + $0x40] sm:$0xff] }
  0xd1   : > { %1024 = vmatmul.mubr.bf16.gmra.mxu0 %v1945_v19 }
  0xd2   : > { %1161 = vmatmul.mubr.bf16.gmra.mxu1 %v1946_v20 }
 0x131   : > { %v1588_v21 = vpop.f32.mrf.mxu0 }
 0x132   : > { %v1682_v22 = vpop.f32.mrf.mxu1 }
 0x133   : > { %v1589_v23 = vpop.f32.mrf.mxu0 }
 0x134   : > { %v1590_v24 = vadd.f32 %v1589_v23, %v1588_v21  ;;  %v1683_v25 = vpop.f32.mrf.mxu1 }
 0x135   : > { %v1684_v26 = vadd.f32 %v1683_v25, %v1682_v22  ;;  %v1591_v27 = vpop.f32.mrf.mxu0 }
 0x136   : > { %v1685_v29 = vpop.f32.mrf.mxu1 }
 0x137   : > { %v1067_v30 = vadd.f32 %v1684_v26, %v1590_v24  ;;  %v1592_v31 = vpop.f32.mrf.mxu0 }
 0x138   : > { %v1593_v32 = vadd.f32 %v1592_v31, %v1591_v27  ;;  %v1686_v33 = vpop.f32.mrf.mxu1  ;;  %v308_v27 = vld [vmem:[#allocation2 + $0x78] sm:$0xff] }
 0x139   : > { %v1169_v34 = vadd.f32 %v1067_v30, %v301_v28  ;;  %v1687_v35 = vadd.f32 %v1686_v33, %v1685_v29  ;;  %v1594_v36 = vpop.f32.mrf.mxu0 }
 0x13a   : > { %v1688_v38 = vpop.f32.mrf.mxu1 }
 0x13b   : > { %1195 = vst [vmem:[#allocation2 + $0xb0] sm:$0xff] %v1169_v34  ;;  %v1070_v39 = vadd.f32 %v1687_v35, %v1593_v32  ;;  %v1595_v40 = vpop.f32.mrf.mxu0 }
 0x13c   : > { %v1596_v41 = vadd.f32 %v1595_v40, %v1594_v36  ;;  %v1689_v42 = vpop.f32.mrf.mxu1  ;;  %v309_v36 = vld [vmem:[#allocation2 + $0x80] sm:$0xff] }
 0x13d   : > { %v1170_v43 = vadd.f32 %v1070_v39, %v302_v37  ;;  %v1690_v44 = vadd.f32 %v1689_v42, %v1688_v38  ;;  %v1597_v45 = vpop.f32.mrf.mxu0 }
 0x13e   : > { %v1691_v47 = vpop.f32.mrf.mxu1 }
 0x13f   : > { %1196 = vst [vmem:[#allocation2] sm:$0xff] %v1170_v43  ;;  %v1075_v48 = vadd.f32 %v1690_v44, %v1596_v41  ;;  %v1598_v49 = vpop.f32.mrf.mxu0 }
 0x140   : > { %v1599_v50 = vadd.f32 %v1598_v49, %v1597_v45  ;;  %v1692_v51 = vpop.f32.mrf.mxu1  ;;  %v310_v45 = vld [vmem:[#allocation2 + $0xa8] sm:$0xff] }
 0x141   : > { %v1171_v52 = vadd.f32 %v1075_v48, %v303_v46  ;;  %v1693_v53 = vadd.f32 %v1692_v51, %v1691_v47  ;;  %v1600_v54 = vpop.f32.mrf.mxu0 }
 0x142   : > { %v1694_v56 = vpop.f32.mrf.mxu1 }
 0x143   : > { %1197 = vst [vmem:[#allocation2 + $0x10] sm:$0xff] %v1171_v52  ;;  %v1078_v57 = vadd.f32 %v1693_v53, %v1599_v50  ;;  %v1601_v58 = vpop.f32.mrf.mxu0 }
 0x144   : > { %v1602_v59 = vadd.f32 %v1601_v58, %v1600_v54  ;;  %v1695_v60 = vpop.f32.mrf.mxu1  ;;  %v311_v54 = vld [vmem:[#allocation2 + $0x50] sm:$0xff] }
 0x145   : > { %v1172_v61 = vadd.f32 %v1078_v57, %v304_v55  ;;  %v1696_v62 = vadd.f32 %v1695_v60, %v1694_v56  ;;  %v1603_v63 = vpop.f32.mrf.mxu0 }
 0x146   : > { %v1697_v1 = vpop.f32.mrf.mxu1 }
 0x147   : > { %1198 = vst [vmem:[#allocation2 + $0x48] sm:$0xff] %v1172_v61  ;;  %v1083_v2 = vadd.f32 %v1696_v62, %v1602_v59  ;;  %v1604_v3 = vpop.f32.mrf.mxu0 }
 0x148   : > { %v1605_v4 = vadd.f32 %v1604_v3, %v1603_v63  ;;  %v1698_v5 = vpop.f32.mrf.mxu1  ;;  %v312_v63 = vld [vmem:[#allocation2 + $0x30] sm:$0xff] }
 0x149   : > { %v1173_v6 = vadd.f32 %v1083_v2, %v305_v0  ;;  %v1699_v7 = vadd.f32 %v1698_v5, %v1697_v1  ;;  %v1606_v8 = vpop.f32.mrf.mxu0 }
 0x14a   : > { %v1700_v10 = vpop.f32.mrf.mxu1 }
 0x14b   : > { %1199 = vst [vmem:[#allocation2 + $0x60] sm:$0xff] %v1173_v6  ;;  %v1086_v11 = vadd.f32 %v1699_v7, %v1605_v4  ;;  %v1607_v12 = vpop.f32.mrf.mxu0 }
 0x14c   : > { %v1608_v13 = vadd.f32 %v1607_v12, %v1606_v8  ;;  %v1701_v14 = vpop.f32.mrf.mxu1  ;;  %v313_v8 = vld [vmem:[#allocation2 + $0x88] sm:$0xff] }
 0x14d   : > { %v1174_v15 = vadd.f32 %v1086_v11, %v306_v9  ;;  %v1702_v16 = vadd.f32 %v1701_v14, %v1700_v10  ;;  %v1609_v17 = vpop.f32.mrf.mxu0 }
 0x14e   : > { %v1703_v19 = vpop.f32.mrf.mxu1 }
 0x14f   : > { %1200 = vst [vmem:[#allocation2 + $0x28] sm:$0xff] %v1174_v15  ;;  %v1091_v20 = vadd.f32 %v1702_v16, %v1608_v13  ;;  %v1610_v21 = vpop.f32.mrf.mxu0 }
 0x150   : > { %v1611_v22 = vadd.f32 %v1610_v21, %v1609_v17  ;;  %v1704_v23 = vpop.f32.mrf.mxu1  ;;  %v314_v17 = vld [vmem:[#allocation2 + $0x70] sm:$0xff] }
 0x151   : > { %v1175_v24 = vadd.f32 %v1091_v20, %v307_v18  ;;  %v1705_v25 = vadd.f32 %v1704_v23, %v1703_v19  ;;  %v1612_v26 = vpop.f32.mrf.mxu0 }
 0x152   : > { %v1706_v28 = vpop.f32.mrf.mxu1 }
 0x153   : > { %1201 = vst [vmem:[#allocation2 + $0x40] sm:$0xff] %v1175_v24  ;;  %v1094_v29 = vadd.f32 %v1705_v25, %v1611_v22  ;;  %v1613_v30 = vpop.f32.mrf.mxu0 }
 0x154   : > { %v1614_v31 = vadd.f32 %v1613_v30, %v1612_v26  ;;  %v1707_v32 = vpop.f32.mrf.mxu1  ;;  %v315_v26 = vld [vmem:[#allocation2 + $0x8] sm:$0xff] }
 0x155   : > { %v1176_v33 = vadd.f32 %v1094_v29, %v308_v27  ;;  %v1708_v34 = vadd.f32 %v1707_v32, %v1706_v28  ;;  %v1615_v35 = vpop.f32.mrf.mxu0 }
 0x156   : > { %v1709_v37 = vpop.f32.mrf.mxu1 }
 0x157   : > { %1202 = vst [vmem:[#allocation2 + $0x78] sm:$0xff] %v1176_v33  ;;  %v1099_v38 = vadd.f32 %v1708_v34, %v1614_v31  ;;  %v1616_v39 = vpop.f32.mrf.mxu0 }
 0x158   : > { %v1617_v40 = vadd.f32 %v1616_v39, %v1615_v35  ;;  %v1710_v41 = vpop.f32.mrf.mxu1  ;;  %v316_v35 = vld [vmem:[#allocation2 + $0x38] sm:$0xff] }
 0x159   : > { %v1177_v42 = vadd.f32 %v1099_v38, %v309_v36  ;;  %v1711_v43 = vadd.f32 %v1710_v41, %v1709_v37  ;;  %v1618_v44 = vpop.f32.mrf.mxu0 }
 0x15a   : > { %v1712_v46 = vpop.f32.mrf.mxu1 }
 0x15b   : > { %1203 = vst [vmem:[#allocation2 + $0x80] sm:$0xff] %v1177_v42  ;;  %v1102_v47 = vadd.f32 %v1711_v43, %v1617_v40  ;;  %v1619_v48 = vpop.f32.mrf.mxu0 }
 0x15c   : > { %v1620_v49 = vadd.f32 %v1619_v48, %v1618_v44  ;;  %v1713_v50 = vpop.f32.mrf.mxu1  ;;  %v317_v44 = vld [vmem:[#allocation2 + $0x20] sm:$0xff] }
 0x15d   : > { %v1178_v51 = vadd.f32 %v1102_v47, %v310_v45  ;;  %v1714_v52 = vadd.f32 %v1713_v50, %v1712_v46  ;;  %v1621_v53 = vpop.f32.mrf.mxu0 }
 0x15e   : > { %v1715_v55 = vpop.f32.mrf.mxu1 }
 0x15f   : > { %1204 = vst [vmem:[#allocation2 + $0xa8] sm:$0xff] %v1178_v51  ;;  %v1107_v56 = vadd.f32 %v1714_v52, %v1620_v49  ;;  %v1622_v57 = vpop.f32.mrf.mxu0 }
 0x160   : > { %v1623_v58 = vadd.f32 %v1622_v57, %v1621_v53  ;;  %v1716_v59 = vpop.f32.mrf.mxu1  ;;  %v318_v53 = vld [vmem:[#allocation2 + $0xb8] sm:$0xff] }
 0x161   : > { %v1179_v60 = vadd.f32 %v1107_v56, %v311_v54  ;;  %v1717_v61 = vadd.f32 %v1716_v59, %v1715_v55  ;;  %v1624_v62 = vpop.f32.mrf.mxu0 }
 0x162   : > { %v1718_v0 = vpop.f32.mrf.mxu1 }
 0x163   : > { %1205 = vst [vmem:[#allocation2 + $0x50] sm:$0xff] %v1179_v60  ;;  %v1110_v1 = vadd.f32 %v1717_v61, %v1623_v58  ;;  %v1625_v2 = vpop.f32.mrf.mxu0 }
 0x164   : > { %v1626_v3 = vadd.f32 %v1625_v2, %v1624_v62  ;;  %v1719_v4 = vpop.f32.mrf.mxu1  ;;  %v319_v62 = vld [vmem:[#allocation2 + $0x58] sm:$0xff] }
 0x165   : > { %v1180_v5 = vadd.f32 %v1110_v1, %v312_v63  ;;  %v1720_v6 = vadd.f32 %v1719_v4, %v1718_v0  ;;  %v1627_v7 = vpop.f32.mrf.mxu0 }
 0x166   : > { %v1721_v9 = vpop.f32.mrf.mxu1 }
 0x167   : > { %1206 = vst [vmem:[#allocation2 + $0x30] sm:$0xff] %v1180_v5  ;;  %v1115_v10 = vadd.f32 %v1720_v6, %v1626_v3  ;;  %v1628_v11 = vpop.f32.mrf.mxu0 }
 0x168   : > { %v1629_v12 = vadd.f32 %v1628_v11, %v1627_v7  ;;  %v1722_v13 = vpop.f32.mrf.mxu1  ;;  %v320_v7 = vld [vmem:[#allocation2 + $0xc8] sm:$0xff] }
 0x169   : > { %v1181_v14 = vadd.f32 %v1115_v10, %v313_v8  ;;  %v1723_v15 = vadd.f32 %v1722_v13, %v1721_v9  ;;  %v1630_v16 = vpop.f32.mrf.mxu0 }
 0x16a   : > { %v1724_v18 = vpop.f32.mrf.mxu1 }
 0x16b   : > { %1207 = vst [vmem:[#allocation2 + $0x88] sm:$0xff] %v1181_v14  ;;  %v1118_v19 = vadd.f32 %v1723_v15, %v1629_v12  ;;  %v1631_v20 = vpop.f32.mrf.mxu0 }
 0x16c   : > { %v1632_v21 = vadd.f32 %v1631_v20, %v1630_v16  ;;  %v1725_v22 = vpop.f32.mrf.mxu1  ;;  %v321_v16 = vld [vmem:[#allocation2 + $0xa0] sm:$0xff] }
 0x16d   : > { %v1182_v23 = vadd.f32 %v1118_v19, %v314_v17  ;;  %v1726_v24 = vadd.f32 %v1725_v22, %v1724_v18  ;;  %v1633_v25 = vpop.f32.mrf.mxu0 }
 0x16e   : > { %v1727_v27 = vpop.f32.mrf.mxu1 }
 0x16f   : > { %1208 = vst [vmem:[#allocation2 + $0x70] sm:$0xff] %v1182_v23  ;;  %v1123_v28 = vadd.f32 %v1726_v24, %v1632_v21  ;;  %v1634_v29 = vpop.f32.mrf.mxu0 }
 0x170   : > { %v1635_v30 = vadd.f32 %v1634_v29, %v1633_v25  ;;  %v1728_v31 = vpop.f32.mrf.mxu1  ;;  %v322_v25 = vld [vmem:[#allocation2 + $0x90] sm:$0xff] }
 0x171   : > { %v1183_v32 = vadd.f32 %v1123_v28, %v315_v26  ;;  %v1729_v33 = vadd.f32 %v1728_v31, %v1727_v27  ;;  %v1636_v34 = vpop.f32.mrf.mxu0 }
 0x172   : > { %v1730_v36 = vpop.f32.mrf.mxu1 }
 0x173   : > { %1209 = vst [vmem:[#allocation2 + $0x8] sm:$0xff] %v1183_v32  ;;  %v1126_v37 = vadd.f32 %v1729_v33, %v1635_v30  ;;  %v1637_v38 = vpop.f32.mrf.mxu0 }
 0x174   : > { %v1638_v39 = vadd.f32 %v1637_v38, %v1636_v34  ;;  %v1731_v40 = vpop.f32.mrf.mxu1  ;;  %v323_v34 = vld [vmem:[#allocation2 + $0x98] sm:$0xff] }
 0x175   : > { %v1184_v41 = vadd.f32 %v1126_v37, %v316_v35  ;;  %v1732_v42 = vadd.f32 %v1731_v40, %v1730_v36  ;;  %v1639_v43 = vpop.f32.mrf.mxu0 }
 0x176   : > { %v1733_v45 = vpop.f32.mrf.mxu1 }
 0x177   : > { %1210 = vst [vmem:[#allocation2 + $0x38] sm:$0xff] %v1184_v41  ;;  %v1131_v46 = vadd.f32 %v1732_v42, %v1638_v39  ;;  %v1640_v47 = vpop.f32.mrf.mxu0 }
 0x178   : > { %v1641_v48 = vadd.f32 %v1640_v47, %v1639_v43  ;;  %v1734_v49 = vpop.f32.mrf.mxu1  ;;  %v324_v43 = vld [vmem:[#allocation2 + $0x18] sm:$0xff] }
 0x179   : > { %v1185_v50 = vadd.f32 %v1131_v46, %v317_v44  ;;  %v1735_v51 = vadd.f32 %v1734_v49, %v1733_v45  ;;  %v1642_v52 = vpop.f32.mrf.mxu0 }
 0x17a   : > { %v1736_v54 = vpop.f32.mrf.mxu1 }
 0x17b   : > { %1211 = vst [vmem:[#allocation2 + $0x20] sm:$0xff] %v1185_v50  ;;  %v1134_v55 = vadd.f32 %v1735_v51, %v1641_v48  ;;  %v1643_v56 = vpop.f32.mrf.mxu0 }
 0x17c   : > { %v1644_v57 = vadd.f32 %v1643_v56, %v1642_v52  ;;  %v1737_v58 = vpop.f32.mrf.mxu1  ;;  %v325_v52 = vld [vmem:[#allocation2 + $0xc0] sm:$0xff] }
 0x17d   : > { %v1186_v59 = vadd.f32 %v1134_v55, %v318_v53  ;;  %v1738_v60 = vadd.f32 %v1737_v58, %v1736_v54  ;;  %v1645_v61 = vpop.f32.mrf.mxu0 }
 0x17e   : > { %v1739_v63 = vpop.f32.mrf.mxu1 }
 0x17f   : > { %1212 = vst [vmem:[#allocation2 + $0xb8] sm:$0xff] %v1186_v59  ;;  %v1139_v0 = vadd.f32 %v1738_v60, %v1644_v57  ;;  %v1646_v1 = vpop.f32.mrf.mxu0  ;;  %v326_v60 = vld [vmem:[#allocation2 + $0x68] sm:$0xff] }
 0x180   : > { %v1647_v2 = vadd.f32 %v1646_v1, %v1645_v61  ;;  %v1740_v3 = vpop.f32.mrf.mxu1 }
 0x181   : > { %v1187_v4 = vadd.f32 %v1139_v0, %v319_v62  ;;  %v1741_v5 = vadd.f32 %v1740_v3, %v1739_v63  ;;  %v1648_v6 = vpop.f32.mrf.mxu0 }
 0x182   : > { %v1742_v8 = vpop.f32.mrf.mxu1 }
 0x183   : > { %1213 = vst [vmem:[#allocation2 + $0x58] sm:$0xff] %v1187_v4  ;;  %v1142_v9 = vadd.f32 %v1741_v5, %v1647_v2  ;;  %v1649_v10 = vpop.f32.mrf.mxu0 }
 0x184   : > { %v1650_v11 = vadd.f32 %v1649_v10, %v1648_v6  ;;  %v1743_v12 = vpop.f32.mrf.mxu1 }
 0x185   : > { %v1188_v13 = vadd.f32 %v1142_v9, %v320_v7  ;;  %v1744_v14 = vadd.f32 %v1743_v12, %v1742_v8  ;;  %v1651_v15 = vpop.f32.mrf.mxu0 }
 0x186   : > { %v1745_v17 = vpop.f32.mrf.mxu1 }
 0x187   : > { %1214 = vst [vmem:[#allocation2 + $0xc8] sm:$0xff] %v1188_v13  ;;  %v1147_v18 = vadd.f32 %v1744_v14, %v1650_v11  ;;  %v1652_v19 = vpop.f32.mrf.mxu0 }
 0x188   : > { %v1653_v20 = vadd.f32 %v1652_v19, %v1651_v15  ;;  %v1746_v21 = vpop.f32.mrf.mxu1 }
 0x189   : > { %v1189_v22 = vadd.f32 %v1147_v18, %v321_v16  ;;  %v1747_v23 = vadd.f32 %v1746_v21, %v1745_v17  ;;  %v1654_v24 = vpop.f32.mrf.mxu0 }
 0x18a   : > { %v1748_v26 = vpop.f32.mrf.mxu1 }
 0x18b   : > { %1215 = vst [vmem:[#allocation2 + $0xa0] sm:$0xff] %v1189_v22  ;;  %v1150_v27 = vadd.f32 %v1747_v23, %v1653_v20  ;;  %v1655_v28 = vpop.f32.mrf.mxu0 }
 0x18c   : > { %v1656_v29 = vadd.f32 %v1655_v28, %v1654_v24  ;;  %v1749_v30 = vpop.f32.mrf.mxu1 }
 0x18d   : > { %v1190_v31 = vadd.f32 %v1150_v27, %v322_v25  ;;  %v1750_v32 = vadd.f32 %v1749_v30, %v1748_v26  ;;  %v1657_v33 = vpop.f32.mrf.mxu0 }
 0x18e   : > { %v1751_v35 = vpop.f32.mrf.mxu1 }
 0x18f   : > { %1216 = vst [vmem:[#allocation2 + $0x90] sm:$0xff] %v1190_v31  ;;  %v1155_v36 = vadd.f32 %v1750_v32, %v1656_v29  ;;  %v1658_v37 = vpop.f32.mrf.mxu0 }
 0x190   : > { %v1659_v38 = vadd.f32 %v1658_v37, %v1657_v33  ;;  %v1752_v39 = vpop.f32.mrf.mxu1 }
 0x191   : > { %v1191_v40 = vadd.f32 %v1155_v36, %v323_v34  ;;  %v1753_v41 = vadd.f32 %v1752_v39, %v1751_v35  ;;  %v1660_v42 = vpop.f32.mrf.mxu0 }
 0x192   : > { %v1754_v44 = vpop.f32.mrf.mxu1 }
 0x193   : > { %1217 = vst [vmem:[#allocation2 + $0x98] sm:$0xff] %v1191_v40  ;;  %v1158_v45 = vadd.f32 %v1753_v41, %v1659_v38  ;;  %v1661_v46 = vpop.f32.mrf.mxu0 }
 0x194   : > { %v1662_v47 = vadd.f32 %v1661_v46, %v1660_v42  ;;  %v1755_v48 = vpop.f32.mrf.mxu1 }
 0x195   : > { %v1192_v49 = vadd.f32 %v1158_v45, %v324_v43  ;;  %v1756_v50 = vadd.f32 %v1755_v48, %v1754_v44  ;;  %v1663_v51 = vpop.f32.mrf.mxu0 }
 0x196   : > { %v1757_v53 = vpop.f32.mrf.mxu1 }
 0x197   : > { %1218 = vst [vmem:[#allocation2 + $0x18] sm:$0xff] %v1192_v49  ;;  %v1163_v54 = vadd.f32 %v1756_v50, %v1662_v47  ;;  %v1664_v55 = vpop.f32.mrf.mxu0 }
 0x198   : > { %v1665_v56 = vadd.f32 %v1664_v55, %v1663_v51  ;;  %v1758_v57 = vpop.f32.mrf.mxu1 }
 0x199   : > { %v1193_v58 = vadd.f32 %v1163_v54, %v325_v52  ;;  %v1759_v59 = vadd.f32 %v1758_v57, %v1757_v53 }
 0x19b   : > { %1219 = vst [vmem:[#allocation2 + $0xc0] sm:$0xff] %v1193_v58  ;;  %v1166_v61 = vadd.f32 %v1759_v59, %v1665_v56  ;;  %1224 = sbr.rel (%p1563_p7) target bundleno = 443 (0x1bb), region = 52 }
 0x19d   : > { %v1194_v62 = vadd.f32 %v1166_v61, %v326_v60 }
 0x19f   : > { %1220 = vst [vmem:[#allocation2 + $0x68] sm:$0xff] %v1194_v62 }
 0x1a0   : > { %v1225_v63 = vld [vmem:[#allocation2 + $0xb0] sm:$0xff]  ;;  %v2315_v0 = vld [vmem:[%s2411_s2] ss:$0 sm:$0xff]  ;;  %v1228_v5 = vld [vmem:[#allocation2 + $0x48] sm:$0xff] }
 0x1a1   : > { %v2320_v1 = vld [vmem:[%s2412_s3] ss:$0 sm:$0xff]  ;;  %v1258_v2 = vmul.f32 %v2315_v0, %v1225_v63  ;;  %v1227_v4 = vld [vmem:[#allocation2 + $0x10] sm:$0xff]  ;;  %v1261_v8 = vmul.f32 %v2315_v0, %v1228_v5  ;;  %v1230_v10 = vld [vmem:[#allocation2 + $0x28] sm:$0xff] }
 0x1a2   : > { %v1226_v3 = vld [vmem:[#allocation2] sm:$0xff]  ;;  %v1260_v7 = vmul.f32 %v2315_v0, %v1227_v4  ;;  %v1263_v14 = vmul.f32 %v2315_v0, %v1230_v10  ;;  %v1232_v16 = vld [vmem:[#allocation2 + $0x78] sm:$0xff]  ;;  %v1234_v26 = vld [vmem:[#allocation2 + $0xa8] sm:$0xff] }
 0x1a3   : > { %v1259_v6 = vmul.f32 %v2315_v0, %v1226_v3  ;;  %v1229_v9 = vld [vmem:[#allocation2 + $0x60] sm:$0xff]  ;;  %v1291_v12 = vadd.f32 %v2320_v1, %v1258_v2  ;;  %v1294_v19 = vadd.f32 %v2320_v1, %v1261_v8  ;;  %v1265_v20 = vmul.f32 %v2315_v0, %v1232_v16  ;;  %v1235_v27 = vld [vmem:[#allocation2 + $0x50] sm:$0xff]  ;;  %v1237_v33 = vld [vmem:[#allocation2 + $0x88] sm:$0xff] }
 0x1a4   : > { %v1231_v11 = vld [vmem:[#allocation2 + $0x40] sm:$0xff]  ;;  %v1262_v13 = vmul.f32 %v2315_v0, %v1229_v9  ;;  %v1293_v18 = vadd.f32 %v2320_v1, %v1260_v7  ;;  %v1296_v24 = vadd.f32 %v2320_v1, %v1263_v14  ;;  %v1236_v28 = vld [vmem:[#allocation2 + $0x30] sm:$0xff]  ;;  %v1239_v35 = vld [vmem:[#allocation2 + $0x8] sm:$0xff]  ;;  %v1267_v42 = vmul.f32 %v2315_v0, %v1234_v26 }
 0x1a5   : > { %v1264_v15 = vmul.f32 %v2315_v0, %v1231_v11  ;;  %v1292_v17 = vadd.f32 %v2320_v1, %v1259_v6  ;;  %v1233_v21 = vld [vmem:[#allocation2 + $0x80] sm:$0xff]  ;;  %v1317_v22 = vmax.f32 %v1291_v12, 0.0  ;;  %v1320_v31 = vmax.f32 %v1294_v19, 0.0  ;;  %v1238_v34 = vld [vmem:[#allocation2 + $0x70] sm:$0xff]  ;;  %v1240_v40 = vld [vmem:[#allocation2 + $0x38] sm:$0xff] }
 0x1a6   : > { %v1295_v23 = vadd.f32 %v2320_v1, %v1262_v13  ;;  %v1319_v30 = vmax.f32 %v1293_v18, 0.0  ;;  %v1298_v32 = vadd.f32 %v2320_v1, %v1265_v20  ;;  %v1322_v37 = vmax.f32 %v1296_v24, 0.0  ;;  %v1241_v53 = vld [vmem:[#allocation2 + $0x20] sm:$0xff]  ;;  %v1242_v58 = vld [vmem:[#allocation2 + $0xb8] sm:$0xff]  ;;  %v1244_v60 = vld [vmem:[#allocation2 + $0xc8] sm:$0xff] }
 0x1a7   : > { %v1297_v25 = vadd.f32 %v2320_v1, %v1264_v15  ;;  %v1318_v29 = vmax.f32 %v1292_v17, 0.0  ;;  %1343 = vst [vmem:[#allocation8] sm:$0xff] %v1317_v22  ;;  %v1266_v39 = vmul.f32 %v2315_v0, %v1233_v21  ;;  %1346 = vst [vmem:[#allocation8 + $0x18] sm:$0xff] %v1320_v31  ;;  %v1268_v43 = vmul.f32 %v2315_v0, %v1235_v27  ;;  %v1243_v59 = vld [vmem:[#allocation2 + $0x58] sm:$0xff]  ;;  %v1245_v3 = vld [vmem:[#allocation2 + $0xa0] sm:$0xff] }
 0x1a8   : > { %v1321_v36 = vmax.f32 %v1295_v23, 0.0  ;;  %1345 = vst [vmem:[#allocation8 + $0x10] sm:$0xff] %v1319_v30  ;;  %v1324_v41 = vmax.f32 %v1298_v32, 0.0  ;;  %v1269_v44 = vmul.f32 %v2315_v0, %v1236_v28  ;;  %1348 = vst [vmem:[#allocation8 + $0x28] sm:$0xff] %v1322_v37  ;;  %v1270_v46 = vmul.f32 %v2315_v0, %v1237_v33  ;;  %v1246_v4 = vld [vmem:[#allocation2 + $0x90] sm:$0xff]  ;;  %v1247_v5 = vld [vmem:[#allocation2 + $0x98] sm:$0xff] }
 0x1a9   : > { %v1323_v38 = vmax.f32 %v1297_v25, 0.0  ;;  %1344 = vst [vmem:[#allocation8 + $0x8] sm:$0xff] %v1318_v29  ;;  %v1299_v45 = vadd.f32 %v2320_v1, %v1266_v39  ;;  %v1271_v47 = vmul.f32 %v2315_v0, %v1238_v34  ;;  %v1272_v48 = vmul.f32 %v2315_v0, %v1239_v35  ;;  %v1248_v10 = vld [vmem:[#allocation2 + $0x18] sm:$0xff]  ;;  %v1249_v23 = vld [vmem:[#allocation2 + $0xc0] sm:$0xff]  ;;  %v1250_v28 = vld [vmem:[#allocation2 + $0x68] sm:$0xff] }
 0x1aa   : > { %1347 = vst [vmem:[#allocation8 + $0x20] sm:$0xff] %v1321_v36  ;;  %1350 = vst [vmem:[#allocation8 + $0x38] sm:$0xff] %v1324_v41  ;;  %v1300_v49 = vadd.f32 %v2320_v1, %v1267_v42  ;;  %v1301_v50 = vadd.f32 %v2320_v1, %v1268_v43  ;;  %v1302_v51 = vadd.f32 %v2320_v1, %v1269_v44 }
 0x1ab   : > { %1349 = vst [vmem:[#allocation8 + $0x30] sm:$0xff] %v1323_v38  ;;  %v1273_v52 = vmul.f32 %v2315_v0, %v1240_v40  ;;  %v1325_v54 = vmax.f32 %v1299_v45, 0.0  ;;  %v1303_v55 = vadd.f32 %v2320_v1, %v1270_v46  ;;  %v1304_v56 = vadd.f32 %v2320_v1, %v1271_v47 }
 0x1ac   : > { %v1305_v57 = vadd.f32 %v2320_v1, %v1272_v48  ;;  %v1326_v61 = vmax.f32 %v1300_v49, 0.0  ;;  %v1327_v62 = vmax.f32 %v1301_v50, 0.0  ;;  %v1328_v63 = vmax.f32 %v1302_v51, 0.0 }
 0x1ad   : > { %v1306_v2 = vadd.f32 %v2320_v1, %v1273_v52  ;;  %1351 = vst [vmem:[#allocation8 + $0x40] sm:$0xff] %v1325_v54  ;;  %v1329_v6 = vmax.f32 %v1303_v55, 0.0  ;;  %v1330_v7 = vmax.f32 %v1304_v56, 0.0  ;;  %v1274_v9 = vmul.f32 %v2315_v0, %v1241_v53 }
 0x1ae   : > { %v1331_v8 = vmax.f32 %v1305_v57, 0.0  ;;  %1352 = vst [vmem:[#allocation8 + $0x48] sm:$0xff] %v1326_v61  ;;  %1353 = vst [vmem:[#allocation8 + $0x50] sm:$0xff] %v1327_v62  ;;  %v1275_v12 = vmul.f32 %v2315_v0, %v1242_v58  ;;  %v1276_v13 = vmul.f32 %v2315_v0, %v1243_v59  ;;  %v1277_v14 = vmul.f32 %v2315_v0, %v1244_v60 }
 0x1af   : > { %1354 = vst [vmem:[#allocation8 + $0x58] sm:$0xff] %v1328_v63  ;;  %v1332_v11 = vmax.f32 %v1306_v2, 0.0  ;;  %1355 = vst [vmem:[#allocation8 + $0x60] sm:$0xff] %v1329_v6  ;;  %v1307_v15 = vadd.f32 %v2320_v1, %v1274_v9  ;;  %v1278_v16 = vmul.f32 %v2315_v0, %v1245_v3  ;;  %v1279_v17 = vmul.f32 %v2315_v0, %v1246_v4 }
 0x1b0   : > { %1356 = vst [vmem:[#allocation8 + $0x68] sm:$0xff] %v1330_v7  ;;  %1357 = vst [vmem:[#allocation8 + $0x70] sm:$0xff] %v1331_v8  ;;  %v1280_v18 = vmul.f32 %v2315_v0, %v1247_v5  ;;  %v1308_v19 = vadd.f32 %v2320_v1, %v1275_v12  ;;  %v1309_v20 = vadd.f32 %v2320_v1, %v1276_v13 }
 0x1b1   : > { %1358 = vst [vmem:[#allocation8 + $0x78] sm:$0xff] %v1332_v11  ;;  %v1310_v21 = vadd.f32 %v2320_v1, %v1277_v14  ;;  %v1281_v22 = vmul.f32 %v2315_v0, %v1248_v10  ;;  %v1333_v24 = vmax.f32 %v1307_v15, 0.0  ;;  %v1311_v25 = vadd.f32 %v2320_v1, %v1278_v16 }
 0x1b2   : > { %v1312_v26 = vadd.f32 %v2320_v1, %v1279_v17  ;;  %v1313_v27 = vadd.f32 %v2320_v1, %v1280_v18  ;;  %v1334_v29 = vmax.f32 %v1308_v19, 0.0  ;;  %v1335_v30 = vmax.f32 %v1309_v20, 0.0 }
 0x1b3   : > { %v1336_v31 = vmax.f32 %v1310_v21, 0.0  ;;  %v1314_v32 = vadd.f32 %v2320_v1, %v1281_v22  ;;  %1359 = vst [vmem:[#allocation8 + $0x80] sm:$0xff] %v1333_v24  ;;  %v1337_v33 = vmax.f32 %v1311_v25, 0.0  ;;  %v1282_v36 = vmul.f32 %v2315_v0, %v1249_v23 }
 0x1b4   : > { %v1338_v34 = vmax.f32 %v1312_v26, 0.0  ;;  %v1339_v35 = vmax.f32 %v1313_v27, 0.0  ;;  %1360 = vst [vmem:[#allocation8 + $0x88] sm:$0xff] %v1334_v29  ;;  %1361 = vst [vmem:[#allocation8 + $0x90] sm:$0xff] %v1335_v30  ;;  %v1283_v38 = vmul.f32 %v2315_v0, %v1250_v28 }
 0x1b5   : > { %1362 = vst [vmem:[#allocation8 + $0x98] sm:$0xff] %v1336_v31  ;;  %v1340_v37 = vmax.f32 %v1314_v32, 0.0  ;;  %1363 = vst [vmem:[#allocation8 + $0xa0] sm:$0xff] %v1337_v33  ;;  %v1315_v39 = vadd.f32 %v2320_v1, %v1282_v36 }
 0x1b6   : > { %1364 = vst [vmem:[#allocation8 + $0xa8] sm:$0xff] %v1338_v34  ;;  %1365 = vst [vmem:[#allocation8 + $0xb0] sm:$0xff] %v1339_v35  ;;  %v1316_v40 = vadd.f32 %v2320_v1, %v1283_v38 }
 0x1b7   : > { %1366 = vst [vmem:[#allocation8 + $0xb8] sm:$0xff] %v1340_v37  ;;  %v1341_v41 = vmax.f32 %v1315_v39, 0.0 }
 0x1b8   : > { %v1342_v42 = vmax.f32 %v1316_v40, 0.0 }
 0x1b9   : > { %1367 = vst [vmem:[#allocation8 + $0xc0] sm:$0xff] %v1341_v41 }
 0x1ba   : > { %1368 = vst [vmem:[#allocation8 + $0xc8] sm:$0xff] %v1342_v42 }
 0x1bb PF: > { %s2418_s18 = sadd.s32 4294967295, %s2085_s20   ;;  %s2095_s13 = smov [#allocation8]  }
 0x1bc   : > { %p2376_p11 = scmp.eq.s32.totalorder %s2418_s18, 1  ;;  %s1378_s14 = sshll.u32 %s2095_s13, 4  ;;  %s1379_s14 = int_to_ptr.vmem [resolvable:$true] %s1378_s14 }
 0x1bd   : > { %s2003_s6 = scalar_lea.vmem %s1379_s14, 3328  ;;  %p2010_p6 = scmp.lt.s32.totalorder %s1379_s14, %s1379_s14 }
 0x1be   : > { %p2004_p3 = scmp.ne.s32.totalorder %s1379_s14, %s2003_s6  ;;  %p2011_p8 = scmp.lt.s32.totalorder %s2003_s6, %s2003_s6 }
 0x1c0   : > { %p2005_p4 = pnand %p2004_p3, %p2376_p11  ;;  %p2012_p12 = por %p2011_p8, %p2010_p6 }
 0x1c2   : > { %p2006_p5 = pneg %p2005_p4 }
 0x1c4   : > { %p2013_p13 = pnand %p2012_p12, %p2006_p5 }
 0x1c6   : > { %2016 = shalt.err (!%p2013_p13)
}
 0x1c7   : > { %s2096_s9 = smov 128   ;;  %s2097_s10 = smov 8  }
 0x1c8   : > { %1767 = dma.vmem_to_hbm [thread:$0]  (%p2376_p11), %s1379_s14, 3328, %s2413_s4, [#allocation5], %s2096_s9, %s2096_s9, %s2097_s10  }
 0x1c9   : > { %2060 = dma.done.wait (%p2376_p11), [#allocation5], 3328  }
 0x1ca   : > { %2062 = vsyncadd (%p2376_p11), [#allocation5], 4294963968 }
 0x1cb PF: > { %s21_s20 = sadd.s32 1, %s2085_s20   ;;  %s2420_s15 = smov %s2069_s16 }
 0x1cc   : > { %p18_p10 = scmp.ge.s32.totalorder %s21_s20, 4   ;;  %s2421_s16 = smov %s2073_s17 }
 0x1cd   : > { %s2422_s17 = smov %s2170_s26  ;;  %s2423_s18 = smov %s2081_s19 }
 0x1ce   : > { %s2424_s19 = smov %s2426_s22  ;;  %20 = sbr.rel (!%p18_p10) target bundleno = 7 (0x7), region = 95 }
 0x1d3   :  { %1394 = vsyncpa [#allocation4], 1 }
 0x1d4   :  { %1396 = vsyncpa [#allocation4 + $0x1], 1 }
 0x1d5   :  { %1397 = vsyncpa [#allocation7], 1 }
 0x1d6   :  { %1399 = vsyncpa [#allocation7 + $0x1], 1 }
 0x1d7   :  { %1400 = vsyncpa [#allocation5], 1 }
 0x1d8   :  { %1402 = vsyncpa [#allocation5 + $0x1], 1 }

</bundles_post_ra>
